<compile_context>
chip_gen: v6e
topology: v6e:2x2x1
jax: 0.10.0
libtpu: 0.0.40
codegen_flags: <defaults>
</compile_context>

<pallas_src>
import jax
import jax.numpy as jnp
from jax.experimental import pallas as pl
from jax.experimental.pallas import tpu as pltpu


def _decode_block_kernel(x_ref, w1_ref, b1_ref, w2_ref, b2_ref, o_ref):
    """Single invocation, whole problem resident in VMEM.

    x_ref  : (B, H, L)      input, L = W*C (lane-dense)
    w1_ref : (3*L, L)       conv1 fused banded weights (dy stacked along K)
    b1_ref : (1, L)         conv1 bias tiled across W
    w2_ref : (3*L, L)       conv2 fused banded weights
    b2_ref : (1, L)         conv2 bias tiled across W
    o_ref  : (B, H, L)
    """
    B, H, L = o_ref.shape

    x = x_ref[...].astype(jnp.float32)                      # (B, H, L)
    zrow = jnp.zeros((B, 1, L), jnp.float32)

    def conv3x3(v):
        """3x3 SAME conv as one MXU matmul. v: (B, H, L) f32 -> (B*H, L)."""
        vp = jnp.concatenate([zrow, v, zrow], axis=1)        # (B, H+2, L) in-reg pad
        # im2col over dy only (dx already folded into the banded weights).
        cols = jnp.concatenate(
            [vp[:, dy:dy + H, :].reshape(B * H, L) for dy in range(3)],
            axis=-1)                                         # (B*H, 3*L)
        return cols

    # conv1 + bias + ReLU
    y1 = jnp.dot(conv3x3(x), w1_ref[...],
                 preferred_element_type=jnp.float32) + b1_ref[...]
    y1 = jnp.maximum(y1, 0.0)                                # (B*H, L)

    # conv2 + bias
    y2 = jnp.dot(conv3x3(y1.reshape(B, H, L)), w2_ref[...],
                 preferred_element_type=jnp.float32) + b2_ref[...]

    # identity shortcut + final ReLU
    out = jnp.maximum(y2 + x.reshape(B * H, L), 0.0)
    o_ref[...] = out.reshape(B, H, L).astype(o_ref.dtype)


def _banded_conv_weights(w_taps, W):
    """(9, Cin, Cout) HWIO-flattened taps -> (3*W*C, W*C) fused banded matrix.

    For each dy, the dx taps become block off-diagonals:
      M_dy[(w+dx-1)*C + ci, w*C + co] = w_taps[dy*3+dx, ci, co]
    so the lane-dense row (length W*C) times M_dy realizes all dx shifts and
    the channel contraction in one matmul.  The three dy matrices are stacked
    along K.
    """
    C = w_taps.shape[1]
    mats = []
    for dy in range(3):
        M = jnp.zeros((W * C, W * C), w_taps.dtype)
        for dx in range(3):
            shift = jnp.eye(W, k=1 - dx, dtype=w_taps.dtype)   # S[w+dx-1, w] = 1
            M = M + jnp.kron(shift, w_taps[dy * 3 + dx])
        mats.append(M)
    return jnp.concatenate(mats, axis=0)                       # (3*W*C, W*C)


@jax.jit
def basic_decode_block(x_nchw, w1, b1, w2, b2):
    """x_nchw: (B, C, H, W) float32 -> (B, C, H, W) float32."""
    B, C, H, W = x_nchw.shape
    L = W * C

    # NCHW -> lane-dense (B, H, W*C).  (Interface-mandated layout change.)
    x = jnp.transpose(x_nchw, (0, 2, 3, 1)).reshape(B, H, L)

    # Precompute fused banded weights / tiled biases (tiny; fused by XLA).
    w1b = _banded_conv_weights(w1, W)
    w2b = _banded_conv_weights(w2, W)
    b1t = jnp.tile(b1.reshape(C), W).reshape(1, L)
    b2t = jnp.tile(b2.reshape(C), W).reshape(1, L)

    out = pl.pallas_call(
        _decode_block_kernel,
        out_shape=jax.ShapeDtypeStruct((B, H, L), x_nchw.dtype),
        in_specs=[pl.BlockSpec(memory_space=pltpu.MemorySpace.VMEM)] * 5,
        out_specs=pl.BlockSpec(memory_space=pltpu.MemorySpace.VMEM),
    )(x, w1b, b1t, w2b, b2t)

    # back to NCHW
    return jnp.transpose(out.reshape(B, H, W, C), (0, 3, 1, 2))


def _reference(x_nchw, w1, b1, w2, b2):
    """Pure-JAX reference of the same forward pass."""
    B, C, H, W = x_nchw.shape
    x = jnp.transpose(x_nchw, (0, 2, 3, 1))
    dn = ("NHWC", "HWIO", "NHWC")
    k1 = w1.reshape(3, 3, C, C)
    k2 = w2.reshape(3, 3, C, C)
    y1 = jax.lax.conv_general_dilated(x, k1, (1, 1), "SAME",
                                      dimension_numbers=dn) + b1.reshape(1, 1, 1, C)
    y1 = jnp.maximum(y1, 0.0)
    y2 = jax.lax.conv_general_dilated(y1, k2, (1, 1), "SAME",
                                      dimension_numbers=dn) + b2.reshape(1, 1, 1, C)
    out = jnp.maximum(y2 + x, 0.0)
    return jnp.transpose(out, (0, 3, 1, 2))


if __name__ == "__main__":
    # in_channels == out_channels == 8 (i_block > 0); W*C = 128 -> lane-dense.
    B, C, H, W = 2, 8, 16, 16

    key = jax.random.PRNGKey(0)
    kx, kw1, kb1, kw2, kb2 = jax.random.split(key, 5)

    x = jax.random.normal(kx, (B, C, H, W), dtype=jnp.float32)
    # Conv weights as (9, Cin, Cout) = HWIO flattened over the 3x3 taps.
    w1 = jax.random.normal(kw1, (9, C, C), dtype=jnp.float32) * 0.1
    b1 = jax.random.normal(kb1, (1, C), dtype=jnp.float32) * 0.1
    w2 = jax.random.normal(kw2, (9, C, C), dtype=jnp.float32) * 0.1
    b2 = jax.random.normal(kb2, (1, C), dtype=jnp.float32) * 0.1

    out = basic_decode_block(x, w1, b1, w2, b2)
    out = jax.block_until_ready(out)

    ref = jax.block_until_ready(_reference(x, w1, b1, w2, b2))
    assert out.shape == (B, C, H, W)
    assert jnp.allclose(out, ref, rtol=1e-4, atol=1e-5), (
        "mismatch vs reference: max abs err = %g"
        % float(jnp.max(jnp.abs(out - ref))))

    print("KERNEL_OK")
</pallas_src>

<mosaic_0001>
module attributes {stable_mosaic.version = 11 : i64} {
  func.func @_decode_block_kernel(%arg0: memref<2x16x128xf32, #tpu.memory_space<vmem>>, %arg1: memref<384x128xf32, #tpu.memory_space<vmem>>, %arg2: memref<1x128xf32, #tpu.memory_space<vmem>>, %arg3: memref<384x128xf32, #tpu.memory_space<vmem>>, %arg4: memref<1x128xf32, #tpu.memory_space<vmem>>, %arg5: memref<2x16x128xf32, #tpu.memory_space<vmem>>) attributes {dimension_semantics = [], scalar_prefetch = 0 : i64, scratch_operands = 0 : i64, tpu.core_type = #tpu.core_type<tc>} {
    %c0 = arith.constant 0 : index
    %c0_0 = arith.constant 0 : index
    %c0_1 = arith.constant 0 : index
    %0 = vector.load %arg0[%c0, %c0_0, %c0_1] : memref<2x16x128xf32, #tpu.memory_space<vmem>>, vector<2x16x128xf32>
    %cst = arith.constant 0.000000e+00 : f32
    %1 = vector.broadcast %cst : f32 to vector<2x1x128xf32>
    %2 = tpu.concatenate %1, %0, %1 in 1 : vector<2x1x128xf32>, vector<2x16x128xf32>, vector<2x1x128xf32> -> vector<2x18x128xf32>
    %3 = vector.extract_strided_slice %2 {offsets = [0, 0, 0], sizes = [2, 16, 128], strides = [1, 1, 1]} : vector<2x18x128xf32> to vector<2x16x128xf32>
    %4 = vector.shape_cast %3 : vector<2x16x128xf32> to vector<32x128xf32>
    %5 = vector.extract_strided_slice %2 {offsets = [0, 1, 0], sizes = [2, 16, 128], strides = [1, 1, 1]} : vector<2x18x128xf32> to vector<2x16x128xf32>
    %6 = vector.shape_cast %5 : vector<2x16x128xf32> to vector<32x128xf32>
    %7 = vector.extract_strided_slice %2 {offsets = [0, 2, 0], sizes = [2, 16, 128], strides = [1, 1, 1]} : vector<2x18x128xf32> to vector<2x16x128xf32>
    %8 = vector.shape_cast %7 : vector<2x16x128xf32> to vector<32x128xf32>
    %9 = tpu.concatenate %4, %6, %8 in 1 : vector<32x128xf32>, vector<32x128xf32>, vector<32x128xf32> -> vector<32x384xf32>
    %c0_2 = arith.constant 0 : index
    %c0_3 = arith.constant 0 : index
    %10 = vector.load %arg1[%c0_2, %c0_3] : memref<384x128xf32, #tpu.memory_space<vmem>>, vector<384x128xf32>
    %cst_4 = arith.constant dense<0.000000e+00> : vector<32x128xf32>
    %11 = tpu.matmul %9, %10, %cst_4 {dimension_numbers = #tpu.dot_dimension_numbers<[1], [0], [0], [1], [0, 0, 1, 1], [], []>} : vector<32x384xf32>, vector<384x128xf32>, vector<32x128xf32> -> vector<32x128xf32>
    %c0_5 = arith.constant 0 : index
    %c0_6 = arith.constant 0 : index
    %12 = vector.load %arg2[%c0_5, %c0_6] : memref<1x128xf32, #tpu.memory_space<vmem>>, vector<1x128xf32>
    %13 = vector.broadcast %12 : vector<1x128xf32> to vector<32x128xf32>
    %14 = arith.addf %11, %13 : vector<32x128xf32>
    %cst_7 = arith.constant 0.000000e+00 : f32
    %15 = vector.broadcast %cst_7 : f32 to vector<32x128xf32>
    %16 = arith.maximumf %14, %15 : vector<32x128xf32>
    %17 = vector.shape_cast %16 : vector<32x128xf32> to vector<2x16x128xf32>
    %18 = tpu.concatenate %1, %17, %1 in 1 : vector<2x1x128xf32>, vector<2x16x128xf32>, vector<2x1x128xf32> -> vector<2x18x128xf32>
    %19 = vector.extract_strided_slice %18 {offsets = [0, 0, 0], sizes = [2, 16, 128], strides = [1, 1, 1]} : vector<2x18x128xf32> to vector<2x16x128xf32>
    %20 = vector.shape_cast %19 : vector<2x16x128xf32> to vector<32x128xf32>
    %21 = vector.extract_strided_slice %18 {offsets = [0, 1, 0], sizes = [2, 16, 128], strides = [1, 1, 1]} : vector<2x18x128xf32> to vector<2x16x128xf32>
    %22 = vector.shape_cast %21 : vector<2x16x128xf32> to vector<32x128xf32>
    %23 = vector.extract_strided_slice %18 {offsets = [0, 2, 0], sizes = [2, 16, 128], strides = [1, 1, 1]} : vector<2x18x128xf32> to vector<2x16x128xf32>
    %24 = vector.shape_cast %23 : vector<2x16x128xf32> to vector<32x128xf32>
    %25 = tpu.concatenate %20, %22, %24 in 1 : vector<32x128xf32>, vector<32x128xf32>, vector<32x128xf32> -> vector<32x384xf32>
    %c0_8 = arith.constant 0 : index
    %c0_9 = arith.constant 0 : index
    %26 = vector.load %arg3[%c0_8, %c0_9] : memref<384x128xf32, #tpu.memory_space<vmem>>, vector<384x128xf32>
    %cst_10 = arith.constant dense<0.000000e+00> : vector<32x128xf32>
    %27 = tpu.matmul %25, %26, %cst_10 {dimension_numbers = #tpu.dot_dimension_numbers<[1], [0], [0], [1], [0, 0, 1, 1], [], []>} : vector<32x384xf32>, vector<384x128xf32>, vector<32x128xf32> -> vector<32x128xf32>
    %c0_11 = arith.constant 0 : index
    %c0_12 = arith.constant 0 : index
    %28 = vector.load %arg4[%c0_11, %c0_12] : memref<1x128xf32, #tpu.memory_space<vmem>>, vector<1x128xf32>
    %29 = vector.broadcast %28 : vector<1x128xf32> to vector<32x128xf32>
    %30 = arith.addf %27, %29 : vector<32x128xf32>
    %31 = vector.shape_cast %0 : vector<2x16x128xf32> to vector<32x128xf32>
    %32 = arith.addf %30, %31 : vector<32x128xf32>
    %cst_13 = arith.constant 0.000000e+00 : f32
    %33 = vector.broadcast %cst_13 : f32 to vector<32x128xf32>
    %34 = arith.maximumf %32, %33 : vector<32x128xf32>
    %35 = vector.shape_cast %34 : vector<32x128xf32> to vector<2x16x128xf32>
    %c0_14 = arith.constant 0 : index
    %c0_15 = arith.constant 0 : index
    %c0_16 = arith.constant 0 : index
    %36 = vector.load %arg5[%c0_14, %c0_15, %c0_16] : memref<2x16x128xf32, #tpu.memory_space<vmem>>, vector<2x16x128xf32>
    tpu.vector_store %arg5[%c0_14, %c0_15, %c0_16], %35 {strides = array<i32>} : memref<2x16x128xf32, #tpu.memory_space<vmem>>, vector<2x16x128xf32>,
    return
  }
}

</mosaic_0001>

<bundles_post_ra>
// kernel: tile.10
= control target key start
LH: loop header
LB: loop body
LE: loop exit
PB: predicated region body
PF: predicated region fallthrough
CT: control target
= control target key end

     0   :  { %s28_s0 = inlined_call_operand.vmem [shape: f32[8], index: 0, kind: input, shape index: {}]   ;;  %s29_s1 = inlined_call_operand.vmem [shape: f32[16,8], index: 1, kind: output, shape index: {}]  }
   0x1   :  { %v4_v0 = vld [vmem:[%s28_s0] ss:$0 sm:$0xff] }
   0x2   :  { %5 = vst [vmem:[%s29_s1] sm:$0xff] %v4_v0  ;;  %8 = vst [vmem:[%s29_s1 + $0x8] sm:$0xff] %v4_v0 }

// kernel: tile.11
= control target key start
LH: loop header
LB: loop body
LE: loop exit
PB: predicated region body
PF: predicated region fallthrough
CT: control target
= control target key end

     0   :  { %s133_s10 = smov 120   ;;  %s134_s11 = smov 104   ;;  %vm3_vm0 = vcmask 64512   ;;  %vm9_vm1 = vcmask 1048512   ;;  %vm15_vm2 = vcmask 982912   ;;  %vm21_vm3 = vcmask 917312   ;;  %s209_s0 = inlined_call_operand.vmem [shape: f32[16,8], index: 0, kind: input, shape index: {}]   ;;  %s210_s1 = inlined_call_operand.vmem [shape: f32[1,128], index: 1, kind: output, shape index: {}]  }
   0x1   :  { %v103_v0 = vld [vmem:[%s209_s0 + $0xf] sm:$0x1]   ;;  %v105_v1 = vld [vmem:[%s209_s0 + $0xd] sm:$0x1]   ;;  %v104_v2 = vld [vmem:[%s209_s0 + $0xe] sm:$0x1]  }
   0x2   :  { %7 = vrot.lane.b32.xlu0 %v103_v0, %s133_s10  ;;  %19 = vrot.lane.b32.xlu1 %v105_v1, %s134_s11  ;;  %v106_v3 = vld [vmem:[%s209_s0 + $0xc] sm:$0x1]   ;;  %s135_s16 = smov 112   ;;  %s136_s17 = smov 96   ;;  %v107_v4 = vld [vmem:[%s209_s0 + $0xb] sm:$0x1]  }
   0x3   :  { %v108_v5 = vld [vmem:[%s209_s0 + $0xa] sm:$0x1]   ;;  %v2_v6 = vld [vmem:[%s209_s0] sm:$0x1]   ;;  %s137_s24 = smov 88   ;;  %s138_s25 = smov 80  }
   0x4   :  { %4 = vst.msk [vmem:[#allocation0] sm:$0x1] %vm3_vm0, %v2_v6   ;;  %v109_v7 = vld [vmem:[%s209_s0 + $0x9] sm:$0x1]   ;;  %v110_v8 = vld [vmem:[%s209_s0 + $0x8] sm:$0x1]  }
   0x5   :  { %s139_s30 = smov 72   ;;  %s140_s2 = smov 64   ;;  %v111_v9 = vld [vmem:[%s209_s0 + $0x7] sm:$0x1]   ;;  %v112_v10 = vld [vmem:[%s209_s0 + $0x6] sm:$0x1]  }
   0x6   :  { %13 = vrot.lane.b32.xlu0 %v104_v2, %s135_s16  ;;  %25 = vrot.lane.b32.xlu1 %v106_v3, %s136_s17  ;;  %s141_s7 = smov 56   ;;  %s142_s8 = smov 48   ;;  %v113_v11 = vld [vmem:[%s209_s0 + $0x5] sm:$0x1]   ;;  %v114_v12 = vld [vmem:[%s209_s0 + $0x4] sm:$0x1]  }
   0x7   :  { %s143_s13 = smov 40   ;;  %s144_s14 = smov 32   ;;  %v115_v13 = vld [vmem:[%s209_s0 + $0x3] sm:$0x1]   ;;  %v116_v14 = vld [vmem:[%s209_s0 + $0x2] sm:$0x1]  }
   0x8   :  { %s145_s19 = smov 24   ;;  %s146_s20 = smov 16   ;;  %v117_v15 = vld [vmem:[%s209_s0 + $0x1] sm:$0x1]   ;;  %vm27_vm4 = vcmask 851712   ;;  %vm33_vm5 = vcmask 786112  }
   0x9   :  { %s147_s0 = smov 8   ;;  %vm39_vm6 = vcmask 720512   ;;  %vm45_vm7 = vcmask 654912   ;;  %vm51_vm8 = vcmask 589312   ;;  %vm57_vm9 = vcmask 523712  }
   0xa   :  { %31 = vrot.lane.b32.xlu0 %v107_v4, %s137_s24  ;;  %37 = vrot.lane.b32.xlu1 %v108_v5, %s138_s25  ;;  %vm63_vm10 = vcmask 458112   ;;  %vm69_vm11 = vcmask 392512   ;;  %vm75_vm12 = vcmask 326912   ;;  %vm81_vm13 = vcmask 261312  }
   0xb   :  { %vm87_vm14 = vcmask 195712   ;;  %vm93_vm15 = vcmask 130112  }
   0xe   :  { %43 = vrot.lane.b32.xlu0 %v109_v7, %s139_s30  ;;  %49 = vrot.lane.b32.xlu1 %v110_v8, %s140_s2 }
  0x12   :  { %55 = vrot.lane.b32.xlu0 %v111_v9, %s141_s7  ;;  %61 = vrot.lane.b32.xlu1 %v112_v10, %s142_s8 }
  0x16   :  { %67 = vrot.lane.b32.xlu0 %v113_v11, %s143_s13  ;;  %73 = vrot.lane.b32.xlu1 %v114_v12, %s144_s14 }
  0x1a   :  { %79 = vrot.lane.b32.xlu0 %v115_v13, %s145_s19  ;;  %85 = vrot.lane.b32.xlu1 %v116_v14, %s146_s20 }
  0x1e   :  { %91 = vrot.lane.b32.xlu0 %v117_v15, %s147_s0 }
  0x74   :  { %v8_v16 = vpop.permute.xlu0 %7   ;;  %v20_v17 = vpop.permute.xlu1 %19  }
  0x75   :  { %10 = vst.msk [vmem:[#allocation0] sm:$0x1] %vm9_vm1, %v8_v16  }
  0x78   :  { %v14_v18 = vpop.permute.xlu0 %13   ;;  %v26_v19 = vpop.permute.xlu1 %25  }
  0x79   :  { %16 = vst.msk [vmem:[#allocation0] sm:$0x1] %vm15_vm2, %v14_v18  }
  0x7a   :  { %22 = vst.msk [vmem:[#allocation0] sm:$0x1] %vm21_vm3, %v20_v17  }
  0x7b   :  { %28 = vst.msk [vmem:[#allocation0] sm:$0x1] %vm27_vm4, %v26_v19  }
  0x7c   :  { %v32_v20 = vpop.permute.xlu0 %31   ;;  %v38_v21 = vpop.permute.xlu1 %37  }
  0x7d   :  { %34 = vst.msk [vmem:[#allocation0] sm:$0x1] %vm33_vm5, %v32_v20  }
  0x7e   :  { %40 = vst.msk [vmem:[#allocation0] sm:$0x1] %vm39_vm6, %v38_v21  }
  0x80   :  { %v44_v22 = vpop.permute.xlu0 %43   ;;  %v50_v23 = vpop.permute.xlu1 %49  }
  0x81   :  { %46 = vst.msk [vmem:[#allocation0] sm:$0x1] %vm45_vm7, %v44_v22  }
  0x82   :  { %52 = vst.msk [vmem:[#allocation0] sm:$0x1] %vm51_vm8, %v50_v23  }
  0x84   :  { %v56_v24 = vpop.permute.xlu0 %55   ;;  %v62_v25 = vpop.permute.xlu1 %61  }
  0x85   :  { %58 = vst.msk [vmem:[#allocation0] sm:$0x1] %vm57_vm9, %v56_v24  }
  0x86   :  { %64 = vst.msk [vmem:[#allocation0] sm:$0x1] %vm63_vm10, %v62_v25  }
  0x88   :  { %v68_v26 = vpop.permute.xlu0 %67   ;;  %v74_v27 = vpop.permute.xlu1 %73  }
  0x89   :  { %70 = vst.msk [vmem:[#allocation0] sm:$0x1] %vm69_vm11, %v68_v26  }
  0x8a   :  { %76 = vst.msk [vmem:[#allocation0] sm:$0x1] %vm75_vm12, %v74_v27  }
  0x8c   :  { %v80_v28 = vpop.permute.xlu0 %79   ;;  %v86_v29 = vpop.permute.xlu1 %85  }
  0x8d   :  { %82 = vst.msk [vmem:[#allocation0] sm:$0x1] %vm81_vm13, %v80_v28  }
  0x8e   :  { %88 = vst.msk [vmem:[#allocation0] sm:$0x1] %vm87_vm14, %v86_v29  }
  0x90   :  { %v92_v30 = vpop.permute.xlu0 %91  }
  0x91   :  { %94 = vst.msk [vmem:[#allocation0] sm:$0x1] %vm93_vm15, %v92_v30  }
  0x98   :  { %v99_v31 = vld [vmem:[#allocation0] sm:$0x1] }
  0x99   :  { %102 = vst [vmem:[%s210_s1] sm:$0x1] %v99_v31 }

// kernel: basic_decode_block.1
= control target key start
LH: loop header
LB: loop body
LE: loop exit
PB: predicated region body
PF: predicated region fallthrough
CT: control target
= control target key end

     0   :  { %vm28_vm0 = vcmask 1040384   ;;  %vm49_vm1 = vcmask 1046528   ;;  %vm64_vm2 = vcmask 1045504   ;;  %s1244_s1 = inlined_call_operand.vmem [shape: f32[384,128], index: 1, kind: input, shape index: {}]   ;;  %s1245_s0 = inlined_call_operand.vmem [shape: f32[2,16,128], index: 0, kind: input, shape index: {}]   ;;  %s1246_s3 = inlined_call_operand.vmem [shape: f32[384,128], index: 3, kind: input, shape index: {}]   ;;  %s1247_s2 = inlined_call_operand.vmem [shape: f32[1,128], index: 2, kind: input, shape index: {}]   ;;  %s1248_s4 = inlined_call_operand.vmem [shape: f32[1,128], index: 4, kind: input, shape index: {}]   ;;  %s1249_s5 = inlined_call_operand.vmem [shape: f32[2,16,128], index: 5, kind: output, shape index: {}]  }
   0x1   :  { %v110_v0 = vld [vmem:[%s1244_s1 + $0xf8] sm:$0xff]  ;;  %v109_v2 = vld [vmem:[%s1244_s1 + $0xf0] sm:$0xff]  ;;  %v108_v5 = vld [vmem:[%s1244_s1 + $0xe8] sm:$0xff] }
   0x2   :  { %v94_v1 = vld [vmem:[%s1244_s1 + $0x78] sm:$0xff]  ;;  %611 = vmatprep.subr.mxu0 %v110_v0  ;;  %v93_v3 = vld [vmem:[%s1244_s1 + $0x70] sm:$0xff]  ;;  %v92_v7 = vld [vmem:[%s1244_s1 + $0x68] sm:$0xff] }
   0x3   :  { %v126_v4 = vld [vmem:[%s1244_s1 + $0x178] sm:$0xff]  ;;  %612 = vmatpush3.msra.mxu0 %v94_v1  ;;  %v125_v6 = vld [vmem:[%s1244_s1 + $0x170] sm:$0xff]  ;;  %v124_v8 = vld [vmem:[%s1244_s1 + $0x168] sm:$0xff] }
   0x4   :  { %739 = vmatprep.subr.mxu1 %v126_v4  ;;  %613 = vmatprep.subr.mxu0 %v109_v2  ;;  %v107_v9 = vld [vmem:[%s1244_s1 + $0xe0] sm:$0xff]  ;;  %v106_v12 = vld [vmem:[%s1244_s1 + $0xd8] sm:$0xff]  ;;  %v105_v15 = vld [vmem:[%s1244_s1 + $0xd0] sm:$0xff] }
   0x5   :  { %740 = vmatpush3.msra.mxu1 %v126_v4  ;;  %614 = vmatpush3.msra.mxu0 %v93_v3  ;;  %v91_v10 = vld [vmem:[%s1244_s1 + $0x60] sm:$0xff]  ;;  %v90_v13 = vld [vmem:[%s1244_s1 + $0x58] sm:$0xff]  ;;  %v89_v16 = vld [vmem:[%s1244_s1 + $0x50] sm:$0xff] }
   0x6   :  { %741 = vmatprep.subr.mxu1 %v125_v6  ;;  %615 = vmatprep.subr.mxu0 %v108_v5  ;;  %v123_v11 = vld [vmem:[%s1244_s1 + $0x160] sm:$0xff]  ;;  %v122_v14 = vld [vmem:[%s1244_s1 + $0x158] sm:$0xff]  ;;  %v121_v17 = vld [vmem:[%s1244_s1 + $0x150] sm:$0xff] }
   0x7   :  { %742 = vmatpush3.msra.mxu1 %v125_v6  ;;  %616 = vmatpush3.msra.mxu0 %v92_v7  ;;  %v104_v18 = vld [vmem:[%s1244_s1 + $0xc8] sm:$0xff]  ;;  %v103_v21 = vld [vmem:[%s1244_s1 + $0xc0] sm:$0xff]  ;;  %v102_v24 = vld [vmem:[%s1244_s1 + $0xb8] sm:$0xff] }
   0x8   :  { %743 = vmatprep.subr.mxu1 %v124_v8  ;;  %617 = vmatprep.subr.mxu0 %v107_v9  ;;  %v88_v19 = vld [vmem:[%s1244_s1 + $0x48] sm:$0xff]  ;;  %v87_v22 = vld [vmem:[%s1244_s1 + $0x40] sm:$0xff]  ;;  %v86_v25 = vld [vmem:[%s1244_s1 + $0x38] sm:$0xff] }
   0x9   :  { %744 = vmatpush3.msra.mxu1 %v124_v8  ;;  %618 = vmatpush3.msra.mxu0 %v91_v10  ;;  %v120_v20 = vld [vmem:[%s1244_s1 + $0x148] sm:$0xff]  ;;  %v119_v23 = vld [vmem:[%s1244_s1 + $0x140] sm:$0xff]  ;;  %v118_v26 = vld [vmem:[%s1244_s1 + $0x138] sm:$0xff] }
   0xa   :  { %745 = vmatprep.subr.mxu1 %v123_v11  ;;  %619 = vmatprep.subr.mxu0 %v106_v12  ;;  %v929_v27 = vld [vmem:[%s1245_s0] sm:$0xff]  ;;  %v934_v28 = vld [vmem:[%s1245_s0 + $0x8] sm:$0xff]  ;;  %v101_v29 = vld [vmem:[%s1244_s1 + $0xb0] sm:$0xff] }
   0xb   :  { %746 = vmatpush3.msra.mxu1 %v123_v11  ;;  %620 = vmatpush3.msra.mxu0 %v90_v13  ;;  %v940_v30 = vrot.slane %v929_v27, 7  ;;  %v30_v31 = vrot.slane %v934_v28, 7  ;;  %v85_v32 = vld [vmem:[%s1244_s1 + $0x30] sm:$0xff]  ;;  %v100_v34 = vld [vmem:[%s1244_s1 + $0xa8] sm:$0xff]  ;;  %v99_v39 = vld [vmem:[%s1244_s1 + $0xa0] sm:$0xff] }
   0xc   :  { %747 = vmatprep.subr.mxu1 %v122_v14  ;;  %621 = vmatprep.subr.mxu0 %v105_v15  ;;  %v117_v33 = vld [vmem:[%s1244_s1 + $0x130] sm:$0xff]  ;;  %v84_v35 = vld [vmem:[%s1244_s1 + $0x28] sm:$0xff]  ;;  %v83_v40 = vld [vmem:[%s1244_s1 + $0x20] sm:$0xff] }
   0xd   :  { %748 = vmatpush3.msra.mxu1 %v122_v14  ;;  %622 = vmatpush3.msra.mxu0 %v89_v16  ;;  %v116_v36 = vld [vmem:[%s1244_s1 + $0x128] sm:$0xff]  ;;  %v960_v37 = vsel %vm28_vm0, %v940_v30, %v30_v31  ;;  %v964_v38 = vsel %vm28_vm0, 0.0, %v940_v30  ;;  %v115_v41 = vld [vmem:[%s1244_s1 + $0x120] sm:$0xff]  ;;  %v978_v42 = vld [vmem:[%s1245_s0 + $0x10] sm:$0xff]  ;;  %v43_v50 = vsel %vm28_vm0, %v30_v31, 0.0 }
   0xe   :  { %749 = vmatprep.subr.mxu1 %v121_v17  ;;  %623 = vmatprep.subr.mxu0 %v104_v18  ;;  %v983_v43 = vld [vmem:[%s1245_s0 + $0x18] sm:$0xff]  ;;  %v50_v45 = vrot.slane %v964_v38, 1  ;;  %v51_v46 = vrot.slane %v960_v37, 1  ;;  %v97_v49 = vld [vmem:[%s1244_s1 + $0x90] sm:$0xff]  ;;  %v1001_v51 = vrot.slane %v978_v42, 7  ;;  %v96_v55 = vld [vmem:[%s1244_s1 + $0x88] sm:$0xff] }
   0xf   :  { %750 = vmatpush3.msra.mxu1 %v121_v17  ;;  %624 = vmatpush3.msra.mxu0 %v88_v19  ;;  %v98_v44 = vld [vmem:[%s1244_s1 + $0x98] sm:$0xff]  ;;  %v33_v52 = vrot.slane %v983_v43, 7  ;;  %v81_v53 = vld [vmem:[%s1244_s1 + $0x10] sm:$0xff]  ;;  %v80_v57 = vld [vmem:[%s1244_s1 + $0x8] sm:$0xff]  ;;  %v53_v58 = vrot.slane %v43_v50, 1  ;;  %v65_v61 = vrot.slane %v964_v38, 2 }
  0x10   :  { %751 = vmatprep.subr.mxu1 %v120_v20  ;;  %625 = vmatprep.subr.mxu0 %v103_v21  ;;  %v82_v47 = vld [vmem:[%s1244_s1 + $0x18] sm:$0xff]  ;;  %v113_v54 = vld [vmem:[%s1244_s1 + $0x110] sm:$0xff]  ;;  %v52_v56 = vsel %vm49_vm1, %v50_v45, %v51_v46  ;;  %v95_v59 = vld [vmem:[%s1244_s1 + $0x80] sm:$0xff]  ;;  %v66_v62 = vrot.slane %v960_v37, 2  ;;  %v42_v0 = vsel %vm28_vm0, 0.0, %v1001_v51  ;;  %v68_v2 = vrot.slane %v43_v50, 2 }
  0x11   :  { %752 = vmatpush3.msra.mxu1 %v120_v20  ;;  %626 = vmatpush3.msra.mxu0 %v87_v22  ;;  %v114_v48 = vld [vmem:[%s1244_s1 + $0x118] sm:$0xff]  ;;  %v112_v60 = vld [vmem:[%s1244_s1 + $0x108] sm:$0xff]  ;;  %v1027_v63 = vsel %vm28_vm0, %v1001_v51, %v33_v52  ;;  %v79_v1 = vld [vmem:[%s1244_s1] sm:$0xff]  ;;  %v44_v5 = vsel %vm28_vm0, %v33_v52, 0.0  ;;  %v70_v6 = vrot.slane %v42_v0, 2  ;;  %v54_v8 = vsel %vm49_vm1, %v51_v46, %v53_v58 }
  0x12   :  { %753 = vmatprep.subr.mxu1 %v119_v23  ;;  %627 = vmatprep.subr.mxu0 %v102_v24  ;;  %vm1035_vm3 = vmneg %vm28_vm0  ;;  %v111_v4 = vld [vmem:[%s1244_s1 + $0x100] sm:$0xff]  ;;  %v71_v7 = vrot.slane %v1027_v63, 2  ;;  %v55_v9 = vrot.slane %v42_v0, 1  ;;  %v56_v10 = vrot.slane %v1027_v63, 1  ;;  %v67_v11 = vsel %vm64_vm2, %v65_v61, %v66_v62  ;;  %v391_v12 = vld [vmem:[%s1246_s3 + $0xf8] sm:$0xff] }
  0x13   :  { %754 = vmatpush3.msra.mxu1 %v119_v23  ;;  %628 = vmatpush3.msra.mxu0 %v86_v25  ;;  %v69_v13 = vsel %vm64_vm2, %v66_v62, %v68_v2  ;;  %v73_v14 = vrot.slane %v44_v5, 2  ;;  %v407_v15 = vld [vmem:[%s1246_s3 + $0x178] sm:$0xff]  ;;  %v58_v18 = vrot.slane %v44_v5, 1  ;;  %v390_v20 = vld [vmem:[%s1246_s3 + $0xf0] sm:$0xff]  ;;  %v389_v25 = vld [vmem:[%s1246_s3 + $0xe8] sm:$0xff] }
  0x14   :  { %755 = vmatprep.subr.mxu1 %v118_v26  ;;  %629 = vmatprep.subr.mxu0 %v101_v29  ;;  %v72_v16 = vsel %vm64_vm2, %v70_v6, %v71_v7  ;;  %v57_v17 = vsel %vm49_vm1, %v55_v9, %v56_v10  ;;  %v375_v19 = vld [vmem:[%s1246_s3 + $0x78] sm:$0xff]  ;;  %v406_v22 = vld [vmem:[%s1246_s3 + $0x170] sm:$0xff]  ;;  %v373_v29 = vld [vmem:[%s1246_s3 + $0x68] sm:$0xff] }
  0x15   :  { %756 = vmatpush3.msra.mxu1 %v118_v26  ;;  %630 = vmatpush3.msra.mxu0 %v85_v32  ;;  %v74_v21 = vsel %vm64_vm2, %v71_v7, %v73_v14  ;;  %v59_v23 = vsel %vm49_vm1, %v56_v10, %v58_v18  ;;  %v374_v24 = vld [vmem:[%s1246_s3 + $0x70] sm:$0xff]  ;;  %v405_v26 = vld [vmem:[%s1246_s3 + $0x168] sm:$0xff]  ;;  %v404_v31 = vld [vmem:[%s1246_s3 + $0x160] sm:$0xff] }
  0x16   :  { %757 = vmatprep.subr.mxu1 %v117_v33  ;;  %631 = vmatprep.subr.mxu0 %v100_v34  ;;  %v372_v32 = vld [vmem:[%s1246_s3 + $0x60] sm:$0xff]  ;;  %v403_v34 = vld [vmem:[%s1246_s3 + $0x158] sm:$0xff]  ;;  %v370_v38 = vld [vmem:[%s1246_s3 + $0x50] sm:$0xff] }
  0x17   :  { %758 = vmatpush3.msra.mxu1 %v117_v33  ;;  %632 = vmatpush3.msra.mxu0 %v84_v35  ;;  %v387_v33 = vld [vmem:[%s1246_s3 + $0xd8] sm:$0xff]  ;;  %v400_v45 = vld [vmem:[%s1246_s3 + $0x140] sm:$0xff]  ;;  %v382_v50 = vld [vmem:[%s1246_s3 + $0xb0] sm:$0xff] }
  0x18   :  { %759 = vmatprep.subr.mxu1 %v116_v36  ;;  %633 = vmatprep.subr.mxu0 %v99_v39  ;;  %v371_v35 = vld [vmem:[%s1246_s3 + $0x58] sm:$0xff]  ;;  %v385_v39 = vld [vmem:[%s1246_s3 + $0xc8] sm:$0xff]  ;;  %v368_v46 = vld [vmem:[%s1246_s3 + $0x40] sm:$0xff] }
  0x19   :  { %760 = vmatpush3.msra.mxu1 %v116_v36  ;;  %634 = vmatpush3.msra.mxu0 %v83_v40  ;;  %v386_v36 = vld [vmem:[%s1246_s3 + $0xd0] sm:$0xff]  ;;  %v401_v40 = vld [vmem:[%s1246_s3 + $0x148] sm:$0xff]  ;;  %v364_v58 = vld [vmem:[%s1246_s3 + $0x20] sm:$0xff] }
  0x1a   :  { %761 = vmatprep.subr.mxu1 %v115_v41  ;;  %635 = vmatprep.subr.mxu0 %v98_v44  ;;  %v384_v44 = vld [vmem:[%s1246_s3 + $0xc0] sm:$0xff]  ;;  %v366_v52 = vld [vmem:[%s1246_s3 + $0x30] sm:$0xff]  ;;  %v363_v61 = vld [vmem:[%s1246_s3 + $0x18] sm:$0xff] }
  0x1b   :  { %762 = vmatpush3.msra.mxu1 %v115_v41  ;;  %636 = vmatpush3.msra.mxu0 %v82_v47  ;;  %v369_v41 = vld [vmem:[%s1246_s3 + $0x48] sm:$0xff]  ;;  %v383_v47 = vld [vmem:[%s1246_s3 + $0xb8] sm:$0xff]  ;;  %v378_v62 = vld [vmem:[%s1246_s3 + $0x90] sm:$0xff] }
  0x1c   :  { %763 = vmatprep.subr.mxu1 %v114_v48  ;;  %637 = vmatprep.subr.mxu0 %v97_v49  ;;  %v367_v49 = vld [vmem:[%s1246_s3 + $0x38] sm:$0xff]  ;;  %v362_v0 = vld [vmem:[%s1246_s3 + $0x10] sm:$0xff]  ;;  %v393_v2 = vld [vmem:[%s1246_s3 + $0x108] sm:$0xff] }
  0x1d   :  { %764 = vmatpush3.msra.mxu1 %v114_v48  ;;  %638 = vmatpush3.msra.mxu0 %v81_v53  ;;  %v399_v48 = vld [vmem:[%s1246_s3 + $0x138] sm:$0xff]  ;;  %v381_v53 = vld [vmem:[%s1246_s3 + $0xa8] sm:$0xff]  ;;  %v376_v5 = vld [vmem:[%s1246_s3 + $0x80] sm:$0xff] }
  0x1e   :  { %765 = vmatprep.subr.mxu1 %v113_v54  ;;  %639 = vmatprep.subr.mxu0 %v96_v55  ;;  %v365_v55 = vld [vmem:[%s1246_s3 + $0x28] sm:$0xff]  ;;  %v392_v6 = vld [vmem:[%s1246_s3 + $0x100] sm:$0xff] }
  0x1f   :  { %198 = vmatprep.mubr.f32.mxu0 %v52_v56  ;;  %640 = vmatpush3.msra.mxu0 %v80_v57  ;;  %v380_v56 = vld [vmem:[%s1246_s3 + $0xa0] sm:$0xff] }
  0x20   :  { %766 = vmatpush3.msra.mxu1 %v113_v54  ;;  %641 = vmatprep.subr.mxu0 %v95_v59  ;;  %v397_v54 = vld [vmem:[%s1246_s3 + $0x128] sm:$0xff]  ;;  %v396_v57 = vld [vmem:[%s1246_s3 + $0x120] sm:$0xff]  ;;  %v379_v59 = vld [vmem:[%s1246_s3 + $0x98] sm:$0xff] }
  0x21   :  { %767 = vmatprep.subr.mxu1 %v112_v60  ;;  %642 = vmatpush3.msra.mxu0 %v79_v1  ;;  %v377_v1 = vld [vmem:[%s1246_s3 + $0x88] sm:$0xff]  ;;  %v360_v7 = vld [vmem:[%s1246_s3] sm:$0xff] }
  0x22   :  { %768 = vmatpush3.msra.mxu1 %v112_v60  ;;  %603 = vmatmul.mubr.msk.f32.vlgmr.msra.gmra.mxu0 %vm1035_vm3, %v940_v30  ;;  %v388_v30 = vld [vmem:[%s1246_s3 + $0xe0] sm:$0xff]  ;;  %v395_v60 = vld [vmem:[%s1246_s3 + $0x118] sm:$0xff] }
  0x23   :  { %769 = vmatprep.subr.mxu1 %v111_v4  ;;  %203 = vmatprep.mubr.f32.mxu0 %v54_v8  ;;  %v601_v10 = vld [vmem:[%s1247_s2] ss:$0 sm:$0xff] }
  0x24   :  { %770 = vmatpush3.msra.mxu1 %v111_v4  ;;  %771 = vmatprep.mubr.f32.mxu1 %v67_v11  ;;  %v361_v4 = vld [vmem:[%s1246_s3 + $0x8] sm:$0xff] }
  0x25   :  { %675 = vmatprep.subr.mxu0 %v391_v12  ;;  %772 = vmatmul.mubr.f32.vlgmr.msra.gmra.mxu1 %v69_v13 }
  0x26   :  { %777 = vmatprep.subr.mxu1 %v407_v15  ;;  %204 = vmatmul.mubr.f32.gmra.mxu0 %v960_v37  ;;  %v402_v37 = vld [vmem:[%s1246_s3 + $0x150] sm:$0xff] }
  0x27   :  { %774 = vmatprep.mubr.f32.mxu1 %v72_v16  ;;  %208 = vmatprep.mubr.f32.mxu0 %v57_v17 }
  0x28   :  { %676 = vmatpush3.msra.mxu0 %v375_v19  ;;  %778 = vmatpush3.msra.mxu1 %v407_v15 }
  0x29   :  { %677 = vmatprep.subr.mxu0 %v390_v20  ;;  %775 = vmatmul.mubr.f32.gmra.mxu1 %v74_v21 }
  0x2a   :  { %779 = vmatprep.subr.mxu1 %v406_v22  ;;  %605 = vmatmul.mubr.msk.f32.gmra.mxu0 %vm1035_vm3, %v1001_v51  ;;  %v398_v51 = vld [vmem:[%s1246_s3 + $0x130] sm:$0xff] }
  0x2b   :  { %780 = vmatpush3.msra.mxu1 %v406_v22  ;;  %213 = vmatprep.mubr.f32.mxu0 %v59_v23 }
  0x2c   :  { %678 = vmatpush3.msra.mxu0 %v374_v24  ;;  %781 = vmatprep.subr.mxu1 %v405_v26 }
  0x2d   :  { %679 = vmatprep.subr.mxu0 %v389_v25  ;;  %782 = vmatpush3.msra.mxu1 %v405_v26 }
  0x2e   :  { %680 = vmatpush3.msra.mxu0 %v373_v29  ;;  %783 = vmatprep.subr.mxu1 %v404_v31 }
  0x2f   :  { %214 = vmatmul.mubr.f32.gmra.mxu0 %v1027_v63  ;;  %681 = vmatprep.subr.mxu0 %v388_v30  ;;  %v394_v63 = vld [vmem:[%s1246_s3 + $0x110] sm:$0xff] }
  0x30   :  { %682 = vmatpush3.msra.mxu0 %v372_v32  ;;  %784 = vmatpush3.msra.mxu1 %v404_v31 }
  0x31   :  { %683 = vmatprep.subr.mxu0 %v387_v33  ;;  %785 = vmatprep.subr.mxu1 %v403_v34 }
  0x32   :  { %684 = vmatpush3.msra.mxu0 %v371_v35  ;;  %786 = vmatpush3.msra.mxu1 %v403_v34 }
  0x33   :  { %685 = vmatprep.subr.mxu0 %v386_v36  ;;  %787 = vmatprep.subr.mxu1 %v402_v37 }
  0x34   :  { %686 = vmatpush3.msra.mxu0 %v370_v38  ;;  %788 = vmatpush3.msra.mxu1 %v402_v37 }
  0x35   :  { %687 = vmatprep.subr.mxu0 %v385_v39  ;;  %789 = vmatprep.subr.mxu1 %v401_v40 }
  0x36   :  { %688 = vmatpush3.msra.mxu0 %v369_v41  ;;  %790 = vmatpush3.msra.mxu1 %v401_v40 }
  0x37   :  { %689 = vmatprep.subr.mxu0 %v384_v44  ;;  %791 = vmatprep.subr.mxu1 %v400_v45 }
  0x38   :  { %690 = vmatpush3.msra.mxu0 %v368_v46  ;;  %792 = vmatpush3.msra.mxu1 %v400_v45 }
  0x39   :  { %691 = vmatprep.subr.mxu0 %v383_v47  ;;  %793 = vmatprep.subr.mxu1 %v399_v48 }
  0x3a   :  { %692 = vmatpush3.msra.mxu0 %v367_v49  ;;  %794 = vmatpush3.msra.mxu1 %v399_v48 }
  0x3b   :  { %693 = vmatprep.subr.mxu0 %v382_v50  ;;  %795 = vmatprep.subr.mxu1 %v398_v51 }
  0x3c   :  { %694 = vmatpush3.msra.mxu0 %v366_v52  ;;  %796 = vmatpush3.msra.mxu1 %v398_v51 }
  0x3d   :  { %695 = vmatprep.subr.mxu0 %v381_v53  ;;  %797 = vmatprep.subr.mxu1 %v397_v54 }
  0x3e   :  { %696 = vmatpush3.msra.mxu0 %v365_v55  ;;  %798 = vmatpush3.msra.mxu1 %v397_v54 }
  0x3f   :  { %697 = vmatprep.subr.mxu0 %v380_v56  ;;  %799 = vmatprep.subr.mxu1 %v396_v57 }
  0x40   :  { %698 = vmatpush3.msra.mxu0 %v364_v58  ;;  %800 = vmatpush3.msra.mxu1 %v396_v57 }
  0x41   :  { %699 = vmatprep.subr.mxu0 %v379_v59  ;;  %801 = vmatprep.subr.mxu1 %v395_v60 }
  0x42   :  { %700 = vmatpush3.msra.mxu0 %v363_v61  ;;  %802 = vmatpush3.msra.mxu1 %v395_v60 }
  0x43   :  { %701 = vmatprep.subr.mxu0 %v378_v62  ;;  %803 = vmatprep.subr.mxu1 %v394_v63 }
  0x44   :  { %702 = vmatpush3.msra.mxu0 %v362_v0  ;;  %804 = vmatpush3.msra.mxu1 %v394_v63 }
  0x45   :  { %703 = vmatprep.subr.mxu0 %v377_v1  ;;  %805 = vmatprep.subr.mxu1 %v393_v2 }
  0x46   :  { %704 = vmatpush3.msra.mxu0 %v361_v4  ;;  %806 = vmatpush3.msra.mxu1 %v393_v2 }
  0x47   :  { %705 = vmatprep.subr.mxu0 %v376_v5  ;;  %807 = vmatprep.subr.mxu1 %v392_v6 }
  0x48   :  { %706 = vmatpush3.msra.mxu0 %v360_v7  ;;  %808 = vmatpush3.msra.mxu1 %v392_v6 }
  0xe2   :  { %v643_v8 = vpop.f32.mrf.mxu0 }
  0xe4   :  { %v644_v9 = vpop.f32.mrf.mxu0 }
  0xe5   :  { %v645_v11 = vadd.f32 %v644_v9, %v643_v8  ;;  %v773_v12 = vpop.f32.mrf.mxu1 }
  0xe6   :  { %v646_v13 = vpop.f32.mrf.mxu0 }
  0xe7   :  { %v201_v14 = vadd.f32 %v645_v11, %v601_v10  ;;  %v285_v15 = vpop.f32.mrf.mxu1  ;;  %v606_v11 = vld [vmem:[%s1248_s4] ss:$0 sm:$0xff] }
  0xe8   :  { %v647_v16 = vpop.f32.mrf.mxu0 }
  0xe9   :  { %v648_v17 = vadd.f32 %v647_v16, %v646_v13  ;;  %v286_v18 = vadd.f32 %v285_v15, %v201_v14  ;;  %v776_v20 = vpop.f32.mrf.mxu1 }
  0xea   :  { %v649_v19 = vpop.f32.mrf.mxu0 }
  0xeb   :  { %v206_v21 = vadd.f32 %v648_v17, %v601_v10  ;;  %v304_v22 = vmax.f32 %v286_v18, 0.0  ;;  %v295_v30 = vpop.f32.mrf.mxu1 }
  0xec   :  { %v650_v23 = vpop.f32.mrf.mxu0 }
  0xed   :  { %v291_v24 = vadd.f32 %v773_v12, %v206_v21  ;;  %v312_v25 = vrot.slane %v304_v22, 7  ;;  %v651_v26 = vadd.f32 %v650_v23, %v649_v19 }
  0xef   :  { %v652_v29 = vpop.f32.mrf.mxu0  ;;  %v305_v31 = vmax.f32 %v291_v24, 0.0  ;;  %v324_v32 = vsel %vm28_vm0, 0.0, %v312_v25  ;;  %v211_v33 = vadd.f32 %v651_v26, %v601_v10 }
  0xf0   :  { %v332_v38 = vrot.slane %v324_v32, 1  ;;  %v346_v39 = vrot.slane %v324_v32, 2 }
  0xf1   :  { %v653_v34 = vpop.f32.mrf.mxu0  ;;  %v313_v35 = vrot.slane %v305_v31, 7  ;;  %v296_v37 = vadd.f32 %v295_v30, %v211_v33 }
  0xf2   :  { %v654_v36 = vadd.f32 %v653_v34, %v652_v29 }
  0xf3   :  { %v326_v40 = vsel %vm28_vm0, %v313_v35, 0.0  ;;  %v314_v41 = vsel %vm28_vm0, %v312_v25, %v313_v35  ;;  %v306_v45 = vmax.f32 %v296_v37, 0.0 }
  0xf4   :  { %v216_v44 = vadd.f32 %v654_v36, %v601_v10  ;;  %v349_v46 = vrot.slane %v326_v40, 2  ;;  %v333_v47 = vrot.slane %v314_v41, 1  ;;  %v347_v48 = vrot.slane %v314_v41, 2 }
  0xf5   :  { %v335_v49 = vrot.slane %v326_v40, 1  ;;  %v315_v51 = vrot.slane %v306_v45, 7 }
  0xf6   :  { %v301_v50 = vadd.f32 %v776_v20, %v216_v44  ;;  %v334_v52 = vsel %vm49_vm1, %v332_v38, %v333_v47  ;;  %v348_v53 = vsel %vm64_vm2, %v346_v39, %v347_v48  ;;  %v350_v54 = vsel %vm64_vm2, %v347_v48, %v349_v46 }
  0xf7   :  { %479 = vmatprep.mubr.f32.mxu0 %v334_v52  ;;  %809 = vmatprep.mubr.f32.mxu1 %v348_v53  ;;  %v325_v56 = vsel %vm28_vm0, 0.0, %v315_v51  ;;  %v336_v57 = vsel %vm49_vm1, %v333_v47, %v335_v49 }
  0xf8   :  { %v307_v55 = vmax.f32 %v301_v50, 0.0  ;;  %608 = vmatmul.mubr.msk.f32.vlgmr.msra.gmra.mxu0 %vm1035_vm3, %v312_v25  ;;  %810 = vmatmul.mubr.f32.vlgmr.msra.gmra.mxu1 %v350_v54  ;;  %v337_v60 = vrot.slane %v325_v56, 1  ;;  %v351_v61 = vrot.slane %v325_v56, 2 }
  0xf9   :  { %484 = vmatprep.mubr.f32.mxu0 %v336_v57 }
  0xfa   :  { %v316_v58 = vrot.slane %v307_v55, 7 }
  0xfc   :  { %v317_v59 = vsel %vm28_vm0, %v315_v51, %v316_v58  ;;  %v327_v62 = vsel %vm28_vm0, %v316_v58, 0.0  ;;  %485 = vmatmul.mubr.f32.gmra.mxu0 %v314_v41 }
  0xfd   :  { %v338_v63 = vrot.slane %v317_v59, 1  ;;  %v352_v0 = vrot.slane %v317_v59, 2  ;;  %v354_v1 = vrot.slane %v327_v62, 2  ;;  %v340_v2 = vrot.slane %v327_v62, 1 }
  0xff   :  { %v339_v4 = vsel %vm49_vm1, %v337_v60, %v338_v63  ;;  %v353_v5 = vsel %vm64_vm2, %v351_v61, %v352_v0  ;;  %v355_v6 = vsel %vm64_vm2, %v352_v0, %v354_v1  ;;  %v341_v7 = vsel %vm49_vm1, %v338_v63, %v340_v2 }
 0x100   :  { %489 = vmatprep.mubr.f32.mxu0 %v339_v4  ;;  %812 = vmatprep.mubr.f32.mxu1 %v353_v5 }
 0x101   :  { %610 = vmatmul.mubr.msk.f32.gmra.mxu0 %vm1035_vm3, %v315_v51  ;;  %813 = vmatmul.mubr.f32.gmra.mxu1 %v355_v6 }
 0x102   :  { %494 = vmatprep.mubr.f32.mxu0 %v341_v7 }
 0x105   :  { %495 = vmatmul.mubr.f32.gmra.mxu0 %v317_v59 }
 0x1b8   :  { %v707_v8 = vpop.f32.mrf.mxu0  ;;  %v811_v9 = vpop.f32.mrf.mxu1 }
 0x1ba   :  { %v708_v10 = vpop.f32.mrf.mxu0  ;;  %v566_v15 = vpop.f32.mrf.mxu1 }
 0x1bb   :  { %v709_v12 = vadd.f32 %v708_v10, %v707_v8 }
 0x1bc   :  { %v710_v13 = vpop.f32.mrf.mxu0 }
 0x1bd   :  { %v482_v14 = vadd.f32 %v709_v12, %v606_v11 }
 0x1be   :  { %v711_v16 = vpop.f32.mrf.mxu0 }
 0x1bf   :  { %v567_v17 = vadd.f32 %v566_v15, %v482_v14  ;;  %v712_v3 = vadd.f32 %v711_v16, %v710_v13 }
 0x1c1   :  { %v713_v18 = vpop.f32.mrf.mxu0  ;;  %v585_v19 = vadd.f32 %v567_v17, %v929_v27  ;;  %v487_v20 = vadd.f32 %v712_v3, %v606_v11  ;;  %v814_v21 = vpop.f32.mrf.mxu1 }
 0x1c3   :  { %v714_v22 = vpop.f32.mrf.mxu0  ;;  %v589_v23 = vmax.f32 %v585_v19, 0.0  ;;  %v572_v24 = vadd.f32 %v811_v9, %v487_v20  ;;  %v576_v31 = vpop.f32.mrf.mxu1 }
 0x1c4   :  { %v715_v25 = vadd.f32 %v714_v22, %v713_v18 }
 0x1c5   :  { %v716_v26 = vpop.f32.mrf.mxu0  ;;  %593 = vst [vmem:[%s1249_s5] sm:$0xff] %v589_v23  ;;  %v586_v29 = vadd.f32 %v572_v24, %v934_v28 }
 0x1c6   :  { %v492_v30 = vadd.f32 %v715_v25, %v606_v11 }
 0x1c7   :  { %v717_v32 = vpop.f32.mrf.mxu0  ;;  %v590_v33 = vmax.f32 %v586_v29, 0.0 }
 0x1c8   :  { %v577_v34 = vadd.f32 %v576_v31, %v492_v30  ;;  %v718_v35 = vadd.f32 %v717_v32, %v716_v26 }
 0x1c9   :  { %594 = vst [vmem:[%s1249_s5 + $0x8] sm:$0xff] %v590_v33 }
 0x1ca   :  { %v587_v27 = vadd.f32 %v577_v34, %v978_v42  ;;  %v497_v36 = vadd.f32 %v718_v35, %v606_v11 }
 0x1cc   :  { %v591_v37 = vmax.f32 %v587_v27, 0.0  ;;  %v582_v38 = vadd.f32 %v814_v21, %v497_v36 }
 0x1ce   :  { %595 = vst [vmem:[%s1249_s5 + $0x10] sm:$0xff] %v591_v37  ;;  %v588_v28 = vadd.f32 %v582_v38, %v983_v43 }
 0x1d0   :  { %v592_v39 = vmax.f32 %v588_v28, 0.0 }
 0x1d2   :  { %596 = vst [vmem:[%s1249_s5 + $0x18] sm:$0xff] %v592_v39 }

</bundles_post_ra>
